<compile_context>
chip_gen: v5e
topology: v5e:2x2
jax: 0.10.0
libtpu: 0.0.40
codegen_flags: <defaults>
</compile_context>

<pallas_src>
import functools
import math

import jax
import jax.numpy as jnp
from jax.experimental import pallas as pl
from jax.experimental.pallas import tpu as pltpu


def _round_up(x, m):
    return ((x + m - 1) // m) * m


# ----------------------------------------------------------------------------
# Generation-aware tuning (v5e / v6e / v7x / other)
# ----------------------------------------------------------------------------
_GEN_CFG = {
    # vmem_limit: scoped VMEM cap handed to Mosaic.
    # bm_cap:     max rows per M tile (v7x: keep >=2 parallel steps for 2 TCs
    #             and a small f32 epilogue block for the 64 MiB part).
    # w_budget:   bf16 weight bytes allowed to stay resident as ONE K tile.
    # k_align:    preferred K-tile alignment (256 matches the 256x256 MXU).
    "v5e":   dict(vmem_limit=96 * 2**20, bm_cap=512, w_budget=8 * 2**20,  k_align=128),
    "v6":    dict(vmem_limit=96 * 2**20, bm_cap=512, w_budget=16 * 2**20, k_align=256),
    "v7":    dict(vmem_limit=48 * 2**20, bm_cap=256, w_budget=4 * 2**20,  k_align=256),
    "other": dict(vmem_limit=32 * 2**20, bm_cap=256, w_budget=4 * 2**20,  k_align=128),
}


@functools.lru_cache(maxsize=None)
def _tpu_gen():
    try:
        kind = jax.devices()[0].device_kind.lower()
    except Exception:
        return "other"
    if "v5 lite" in kind or "v5e" in kind:
        return "v5e"
    if "v6" in kind or "trillium" in kind:
        return "v6"
    if "v7" in kind:
        return "v7"
    return "other"


# ----------------------------------------------------------------------------
# Pallas GEMM kernels: bf16 operands, f32 epilogue (bias / residual / ReLU)
# ----------------------------------------------------------------------------
def _make_gemm_kernel_fast(relu: bool, has_res: bool):
    """Single K tile: dot -> bias (+res) (+ReLU) -> store.  No scratch."""

    def kernel(*refs):
        if has_res:
            a_ref, w_ref, b_ref, r_ref, o_ref = refs
        else:
            a_ref, w_ref, b_ref, o_ref = refs
        acc = jnp.dot(a_ref[...], w_ref[...], preferred_element_type=jnp.float32)
        acc = acc + b_ref[...]
        if has_res:
            acc = acc + r_ref[...].astype(jnp.float32)
        if relu:
            acc = jnp.maximum(acc, 0.0)
        o_ref[...] = acc.astype(o_ref.dtype)

    return kernel


def _make_gemm_kernel_acc(relu: bool, has_res: bool):
    """K tiled over an 'arbitrary' grid axis with an f32 VMEM accumulator."""

    def kernel(*refs):
        if has_res:
            a_ref, w_ref, b_ref, r_ref, o_ref, acc_ref = refs
        else:
            a_ref, w_ref, b_ref, o_ref, acc_ref = refs
        kidx = pl.program_id(1)

        @pl.when(kidx == 0)
        def _():
            acc_ref[...] = jnp.zeros_like(acc_ref)

        acc_ref[...] += jnp.dot(a_ref[...], w_ref[...],
                                preferred_element_type=jnp.float32)

        @pl.when(kidx == pl.num_programs(1) - 1)
        def _():
            acc = acc_ref[...] + b_ref[...]
            if has_res:
                acc = acc + r_ref[...].astype(jnp.float32)
            if relu:
                acc = jnp.maximum(acc, 0.0)
            o_ref[...] = acc.astype(o_ref.dtype)

    return kernel


@functools.lru_cache(maxsize=None)
def _build_gemm_call(m_pad, k_pad, n_pad, bm, bk, relu, has_res, gen):
    cfg = _GEN_CFG[gen]
    m_tiles = m_pad // bm
    k_tiles = k_pad // bk

    if k_tiles == 1:
        # Fast path: weight fully resident, no accumulator round-trip.
        kernel = _make_gemm_kernel_fast(relu, has_res)
        in_specs = [
            pl.BlockSpec((bm, k_pad), lambda i: (i, 0)),       # activations
            pl.BlockSpec((k_pad, n_pad), lambda i: (0, 0)),    # folded weight
            pl.BlockSpec((1, n_pad), lambda i: (0, 0)),        # folded BN bias
        ]
        if has_res:
            in_specs.append(pl.BlockSpec((bm, n_pad), lambda i: (i, 0)))
        return pl.pallas_call(
            kernel,
            out_shape=jax.ShapeDtypeStruct((m_pad, n_pad), jnp.bfloat16),
            grid=(m_tiles,),
            in_specs=in_specs,
            out_specs=pl.BlockSpec((bm, n_pad), lambda i: (i, 0)),
            compiler_params=pltpu.CompilerParams(
                dimension_semantics=("parallel",),
                vmem_limit_bytes=cfg["vmem_limit"],
            ),
        )

    # K-tiled path (large weights only).
    kernel = _make_gemm_kernel_acc(relu, has_res)
    in_specs = [
        pl.BlockSpec((bm, bk), lambda i, k: (i, k)),
        pl.BlockSpec((bk, n_pad), lambda i, k: (k, 0)),
        pl.BlockSpec((1, n_pad), lambda i, k: (0, 0)),
    ]
    if has_res:
        in_specs.append(pl.BlockSpec((bm, n_pad), lambda i, k: (i, 0)))
    return pl.pallas_call(
        kernel,
        out_shape=jax.ShapeDtypeStruct((m_pad, n_pad), jnp.bfloat16),
        grid=(m_tiles, k_tiles),
        in_specs=in_specs,
        out_specs=pl.BlockSpec((bm, n_pad), lambda i, k: (i, 0)),
        scratch_shapes=[pltpu.VMEM((bm, n_pad), jnp.float32)],
        compiler_params=pltpu.CompilerParams(
            dimension_semantics=("parallel", "arbitrary"),
            vmem_limit_bytes=cfg["vmem_limit"],
        ),
    )


# ----------------------------------------------------------------------------
# 3x3 stride-1 conv kernel: no im2col in HBM (halo rows via shifted BlockSpecs)
# ----------------------------------------------------------------------------
@functools.lru_cache(maxsize=None)
def _build_conv3x3_call(n, hp, wp, c, cout_pad, relu, gen):
    ho, wo = hp - 2, wp - 2
    k = 9 * c

    def kernel(x0_ref, x1_ref, x2_ref, w_ref, b_ref, o_ref):
        # Build one im2col row-block (wo, 9*c) in vregs from the three halo
        # rows; column order (di, dj, cin) matches the weight reshape.
        taps = []
        for x_ref in (x0_ref, x1_ref, x2_ref):      # di = 0, 1, 2 (row taps)
            for dj in range(3):                     # column taps
                taps.append(x_ref[0, 0, dj:dj + wo, :])
        a = jnp.concatenate(taps, axis=-1)          # (wo, 9*c)
        acc = jnp.dot(a, w_ref[...], preferred_element_type=jnp.float32)
        acc = acc + b_ref[...]
        if relu:
            acc = jnp.maximum(acc, 0.0)
        o_ref[...] = acc.astype(o_ref.dtype)[None, None]

    def x_spec(di):
        # Same padded activation passed three times; block = one input row,
        # shifted by the row-tap offset di.
        return pl.BlockSpec((1, 1, wp, c), lambda nb, hb, d=di: (nb, hb + d, 0, 0))

    return pl.pallas_call(
        kernel,
        out_shape=jax.ShapeDtypeStruct((n, ho, wo, cout_pad), jnp.bfloat16),
        grid=(n, ho),
        in_specs=[x_spec(0), x_spec(1), x_spec(2),
                  pl.BlockSpec((k, cout_pad), lambda nb, hb: (0, 0)),   # weight
                  pl.BlockSpec((1, cout_pad), lambda nb, hb: (0, 0))],  # bias
        out_specs=pl.BlockSpec((1, 1, wo, cout_pad), lambda nb, hb: (nb, hb, 0, 0)),
        compiler_params=pltpu.CompilerParams(
            dimension_semantics=("parallel", "arbitrary"),
            vmem_limit_bytes=_GEN_CFG[gen]["vmem_limit"],
        ),
    )


def _conv3x3_s1(x, p, relu):
    n, h, w, c = x.shape
    assert p["k_pad"] == 9 * c, "expects channel-padded activations"
    xp = jnp.pad(x, ((0, 0), (1, 1), (1, 1), (0, 0)))   # spatial zero-pad only
    call = _build_conv3x3_call(n, h + 2, w + 2, c, p["cout_pad"], relu, _tpu_gen())
    return call(xp, xp, xp, p["w"], p["b"])


# ----------------------------------------------------------------------------
# Tiling helpers
# ----------------------------------------------------------------------------
def _choose_bm(m, gen):
    """Return (m_pad, bm).  No padding / single M step when m fits the cap."""
    cap = _GEN_CFG[gen]["bm_cap"]
    if m <= cap:
        return m, m
    m_pad = _round_up(m, 128)
    for bm in range(cap, 127, -128):
        if m_pad % bm == 0:
            return m_pad, bm
    return m_pad, 128


def _k_tiling(k_pad, n_pad, gen):
    """Pick bk dividing k_pad exactly; single resident tile when it fits."""
    cfg = _GEN_CFG[gen]
    if k_pad * n_pad * 2 <= cfg["w_budget"]:
        return k_pad
    cands = [bk for bk in range(128, k_pad, 128)
             if k_pad % bk == 0 and bk * n_pad * 2 <= cfg["w_budget"]]
    if not cands:
        return 128
    aligned = [bk for bk in cands if bk % cfg["k_align"] == 0]
    return max(aligned) if aligned else max(cands)


# ----------------------------------------------------------------------------
# JAX glue: im2col (strided / 7x7 convs only), fused conv layer, maxpool
# ----------------------------------------------------------------------------
def _extract_patches(x, kh, kw, stride, pad):
    """x: (N,H,W,C) -> (N,Ho,Wo,kh*kw,C) im2col patches (kh*kw > 1 only)."""
    n, h, w, c = x.shape
    xp = jnp.pad(x, ((0, 0), (pad, pad), (pad, pad), (0, 0)))
    ho = (h + 2 * pad - kh) // stride + 1
    wo = (w + 2 * pad - kw) // stride + 1
    pieces = []
    for i in range(kh):
        for j in range(kw):
            pieces.append(xp[:, i:i + stride * (ho - 1) + 1:stride,
                             j:j + stride * (wo - 1) + 1:stride, :])
    return jnp.stack(pieces, axis=3), (n, ho, wo)


def conv_bn_act(x, p, *, stride=1, pad=0, relu=True, residual=None):
    """Fused conv + folded BN (+ residual) (+ ReLU).  NHWC bf16 in / bf16 out.

    Activations keep the channel dim padded to a multiple of 128 so every
    kernel reads/writes lane-dense tiles and 1x1 convs need no im2col at all.
    """
    kh, kw = p["kh"], p["kw"]
    cout_pad = p["cout_pad"]
    gen = _tpu_gen()

    # Bulk of the network: 3x3 stride-1 convs -> halo-row kernel, no im2col.
    if kh == 3 and kw == 3 and stride == 1 and pad == 1 and residual is None:
        return _conv3x3_s1(x, p, relu)

    if kh == 1 and kw == 1:
        xs = x if stride == 1 else x[:, ::stride, ::stride, :]
        n, ho, wo, k_in = xs.shape
        a = xs.reshape(n * ho * wo, k_in)
    else:
        # stride-2 3x3 convs and the 7x7 stem (patch tensor is output-sized).
        patches, (n, ho, wo) = _extract_patches(x, kh, kw, stride, pad)
        a = patches.reshape(n * ho * wo, kh * kw * x.shape[-1])
        k_in = a.shape[1]

    m = n * ho * wo
    k_pad = p["k_pad"]
    if k_in != k_pad:                       # stem only (147 -> 256)
        a = jnp.pad(a, ((0, 0), (0, k_pad - k_in)))
    m_pad, bm = _choose_bm(m, gen)
    if m_pad != m:
        a = jnp.pad(a, ((0, m_pad - m), (0, 0)))

    args = [a, p["w"], p["b"]]
    has_res = residual is not None
    if has_res:
        r = residual.reshape(m, cout_pad)
        if m_pad != m:
            r = jnp.pad(r, ((0, m_pad - m), (0, 0)))
        args.append(r)

    bk = _k_tiling(k_pad, cout_pad, gen)
    out = _build_gemm_call(m_pad, k_pad, cout_pad, bm, bk, relu, has_res, gen)(*args)
    if m_pad != m:
        out = out[:m]
    return out.reshape(n, ho, wo, cout_pad)


def maxpool2d(x, k=3, stride=2, pad=1):
    # Memory-bound: done in plain JAX (XLA fuses pad + 9-way max into one pass).
    n, h, w, c = x.shape
    xp = jnp.pad(x, ((0, 0), (pad, pad), (pad, pad), (0, 0)),
                 constant_values=-jnp.inf)
    ho = (h + 2 * pad - k) // stride + 1
    wo = (w + 2 * pad - k) // stride + 1
    out = None
    for i in range(k):
        for j in range(k):
            s = xp[:, i:i + stride * (ho - 1) + 1:stride,
                   j:j + stride * (wo - 1) + 1:stride, :]
            out = s if out is None else jnp.maximum(out, s)
    return out


# ----------------------------------------------------------------------------
# Parameter init (deterministic, synthetic): BN folded, channel-padded, bf16
# ----------------------------------------------------------------------------
# (bottleneck width, stage output channels, num blocks, first-block stride)
RESNET_50_STAGES = ((16, 64, 3, 1), (32, 128, 4, 2),
                    (64, 256, 6, 2), (128, 512, 3, 2))


def _make_conv_params(key, kh, kw, cin, cout, cin_eff):
    """Random conv+BN params, BN scale folded into weights, padded, flattened."""
    cout_pad = _round_up(cout, 128)
    k1, k2, k3 = jax.random.split(key, 3)
    w = jax.random.normal(k1, (kh, kw, cin, cout), jnp.float32)
    w = w * math.sqrt(2.0 / (kh * kw * cin))
    scale = 1.0 + 0.1 * jax.random.normal(k2, (cout,), jnp.float32)
    bias = 0.1 * jax.random.normal(k3, (cout,), jnp.float32)
    wf = w * scale                                    # fold BN scale into weight
    wf = jnp.pad(wf, ((0, 0), (0, 0), (0, cin_eff - cin), (0, cout_pad - cout)))
    k_true = kh * kw * cin_eff
    k_pad = _round_up(k_true, 128)                    # 128-align only, no over-pad
    wmat = jnp.pad(wf.reshape(k_true, cout_pad),
                   ((0, k_pad - k_true), (0, 0))).astype(jnp.bfloat16)
    b = jnp.pad(bias, (0, cout_pad - cout)).reshape(1, cout_pad)
    return dict(w=wmat, b=b, kh=kh, kw=kw, cout=cout, cout_pad=cout_pad,
                k=k_true, k_pad=k_pad)


def init_resnet_params(key, in_ch=3, stem_ch=16, stages=RESNET_50_STAGES):
    keys = iter(jax.random.split(key, 256))
    params = {"stem": _make_conv_params(next(keys), 7, 7, in_ch, stem_ch,
                                        cin_eff=in_ch)}
    cin, cin_pad = stem_ch, _round_up(stem_ch, 128)
    stage_params = []
    for (width, cout, n_blocks, stride) in stages:
        width_pad = _round_up(width, 128)
        cout_pad = _round_up(cout, 128)
        blocks = []
        for b in range(n_blocks):
            s = stride if b == 0 else 1
            blk = {
                "conv1": _make_conv_params(next(keys), 1, 1, cin, width,
                                           cin_eff=cin_pad),
                "conv2": _make_conv_params(next(keys), 3, 3, width, width,
                                           cin_eff=width_pad),
                "conv3": _make_conv_params(next(keys), 1, 1, width, cout,
                                           cin_eff=width_pad),
            }
            if s != 1 or cin != cout:
                blk["down"] = _make_conv_params(next(keys), 1, 1, cin, cout,
                                                cin_eff=cin_pad)
            blocks.append((blk, s))
            cin, cin_pad = cout, cout_pad
        stage_params.append(blocks)
    params["stages"] = stage_params
    return params


# ----------------------------------------------------------------------------
# Forward pass (matches resnet.forward: returns (output1..output4))
# ----------------------------------------------------------------------------
def _bottleneck(x, blk, stride):
    if "down" in blk:
        sc = conv_bn_act(x, blk["down"], stride=stride, pad=0, relu=False)
    else:
        sc = x
    y = conv_bn_act(x, blk["conv1"], stride=1, pad=0, relu=True)
    y = conv_bn_act(y, blk["conv2"], stride=stride, pad=1, relu=True)
    # last 1x1 conv: residual add + final ReLU fused into the Pallas GEMM
    y = conv_bn_act(y, blk["conv3"], stride=1, pad=0, relu=True, residual=sc)
    return y


def resnet_forward(params, img_nchw):
    # NCHW (PyTorch convention) -> NHWC bf16 internal layout.
    x = jnp.transpose(img_nchw, (0, 2, 3, 1)).astype(jnp.bfloat16)
    x = conv_bn_act(x, params["stem"], stride=2, pad=3, relu=True)
    x = maxpool2d(x, k=3, stride=2, pad=1)
    outputs = []
    for blocks in params["stages"]:
        for blk, s in blocks:
            x = _bottleneck(x, blk, s)
        cout = blocks[-1][0]["conv3"]["cout"]
        # drop the channel padding, back to NCHW f32 for the external interface
        outputs.append(jnp.transpose(x[..., :cout], (0, 3, 1, 2))
                       .astype(jnp.float32))
    # (output1, output2, output3, output4) == (C2, C3, C4, C5)
    return tuple(outputs)


if __name__ == "__main__":
    key = jax.random.PRNGKey(0)
    pkey, xkey = jax.random.split(key)
    params = init_resnet_params(pkey)
    # PyTorch-convention NCHW input at a small size.
    img = jax.random.normal(xkey, (2, 3, 32, 32), jnp.float32)
    outs = resnet_forward(params, img)
    outs = jax.block_until_ready(outs)
    assert outs[0].shape == (2, 64, 8, 8)
    assert outs[1].shape == (2, 128, 4, 4)
    assert outs[2].shape == (2, 256, 2, 2)
    assert outs[3].shape == (2, 512, 1, 1)
    assert all(bool(jnp.isfinite(o).all()) for o in outs)
    print("KERNEL_OK")
</pallas_src>

<mosaic_0001>
module attributes {stable_mosaic.version = 11 : i64} {
  func.func @kernel(%arg0: i32, %arg1: memref<256x256xbf16, #tpu.memory_space<vmem>>, %arg2: memref<256x128xbf16, #tpu.memory_space<vmem>>, %arg3: memref<1x128xf32, #tpu.memory_space<vmem>>, %arg4: memref<256x128xbf16, #tpu.memory_space<vmem>>) attributes {dimension_semantics = [#tpu.dimension_semantics<parallel>], iteration_bounds = array<i64: 2>, scalar_prefetch = 0 : i64, scratch_operands = 0 : i64, tpu.core_type = #tpu.core_type<tc>, window_params = [{transform_indices = @transform_0, window_bounds = array<i64: 256, 256>}, {pipeline_mode = #tpu.pipeline_mode<synchronous>, transform_indices = @transform_1, window_bounds = array<i64: 256, 128>}, {pipeline_mode = #tpu.pipeline_mode<synchronous>, transform_indices = @transform_2, window_bounds = array<i64: 1, 128>}, {transform_indices = @transform_3, window_bounds = array<i64: 256, 128>}]} {
    %c0 = arith.constant 0 : index
    %c0_0 = arith.constant 0 : index
    %0 = vector.load %arg1[%c0, %c0_0] : memref<256x256xbf16, #tpu.memory_space<vmem>>, vector<256x256xbf16>
    %c0_1 = arith.constant 0 : index
    %c0_2 = arith.constant 0 : index
    %1 = vector.load %arg2[%c0_1, %c0_2] : memref<256x128xbf16, #tpu.memory_space<vmem>>, vector<256x128xbf16>
    %cst = arith.constant dense<0.000000e+00> : vector<256x128xf32>
    %2 = tpu.matmul %0, %1, %cst {dimension_numbers = #tpu.dot_dimension_numbers<[1], [0], [0], [1], [0, 0, 1, 1], [], []>} : vector<256x256xbf16>, vector<256x128xbf16>, vector<256x128xf32> -> vector<256x128xf32>
    %c0_3 = arith.constant 0 : index
    %c0_4 = arith.constant 0 : index
    %3 = vector.load %arg3[%c0_3, %c0_4] : memref<1x128xf32, #tpu.memory_space<vmem>>, vector<1x128xf32>
    %4 = vector.broadcast %3 : vector<1x128xf32> to vector<256x128xf32>
    %5 = arith.addf %2, %4 : vector<256x128xf32>
    %cst_5 = arith.constant 0.000000e+00 : f32
    %6 = vector.broadcast %cst_5 : f32 to vector<256x128xf32>
    %7 = arith.maximumf %5, %6 : vector<256x128xf32>
    %8 = arith.truncf %7 : vector<256x128xf32> to vector<256x128xbf16>
    %c0_6 = arith.constant 0 : index
    %c0_7 = arith.constant 0 : index
    %9 = vector.load %arg4[%c0_6, %c0_7] : memref<256x128xbf16, #tpu.memory_space<vmem>>, vector<256x128xbf16>
    tpu.vector_store %arg4[%c0_6, %c0_7], %8 {strides = array<i32>} : memref<256x128xbf16, #tpu.memory_space<vmem>>, vector<256x128xbf16>,
    return
  }
  func.func @transform_0(%arg0: i32) -> (i32, i32) {
    %c0_i32 = arith.constant 0 : i32
    %c0_i32_0 = arith.constant 0 : i32
    return %arg0, %c0_i32 : i32, i32
  }
  func.func @transform_1(%arg0: i32) -> (i32, i32) {
    %c0_i32 = arith.constant 0 : i32
    %c0_i32_0 = arith.constant 0 : i32
    %c0_i32_1 = arith.constant 0 : i32
    return %c0_i32, %c0_i32_0 : i32, i32
  }
  func.func @transform_2(%arg0: i32) -> (i32, i32) {
    %c0_i32 = arith.constant 0 : i32
    %c0_i32_0 = arith.constant 0 : i32
    %c0_i32_1 = arith.constant 0 : i32
    return %c0_i32, %c0_i32_0 : i32, i32
  }
  func.func @transform_3(%arg0: i32) -> (i32, i32) {
    %c0_i32 = arith.constant 0 : i32
    %c0_i32_0 = arith.constant 0 : i32
    return %arg0, %c0_i32 : i32, i32
  }
}

</mosaic_0001>

<bundles_post_ra>
// kernel: tpu_custom_call.1
= control target key start
LH: loop header
LB: loop body
LE: loop exit
PB: predicated region body
PF: predicated region fallthrough
CT: control target
= control target key end

     0   :  { %8 = vsyncpa [#allocation3], 0  ;;  %s1765_s0 = inlined_call_operand.hbm [shape: bf16[512,256], index: 0, kind: input, shape index: {}]   ;;  %s1766_s1 = inlined_call_operand.hbm [shape: bf16[256,128], index: 1, kind: input, shape index: {}]   ;;  %s1767_s2 = inlined_call_operand.vmem [shape: f32[1,128], index: 2, kind: input, shape index: {}]   ;;  %s1768_s3 = inlined_call_operand.hbm [shape: bf16[512,128], index: 3, kind: output, shape index: {}]  }
   0x1   :  { %10 = vsyncpa [#allocation3 + $0x1], 0 }
   0x2   :  { %11 = vsyncpa [#allocation6], 0 }
   0x3   :  { %12 = vsyncpa [#allocation4], 0 }
   0x4   :  { %14 = vsyncpa [#allocation4 + $0x1], 0  ;;  %s1502_s12 = smov 0   ;;  %s1504_s13 = smov 0  }
   0x5   :  { %s1506_s14 = smov 0   ;;  %s1508_s15 = smov 0  }
   0x6 LB: > { %s1523_s16 = sadd.s32 4294967295, %s1473_s15   ;;  %s908_s17 = sadd.s32 4294967294, %s1473_s15   ;;  %s1473_s15 = sphi %s1508_s15, %s1778_s15   ;;  %s1469_s14 = sphi %s1506_s14, %s1777_s14   ;;  %s1465_s13 = sphi %s1504_s13, %s1776_s13   ;;  %s1461_s12 = sphi %s1502_s12, %s1775_s12  }
   0x7   : > { %p40_p0 = scmp.ne.s32.totalorder %s1465_s13, %s1461_s12  ;;  %p41_p1 = scmp.eq.s32.totalorder %s1523_s16, 0 }
   0x8   : > { %p106_p2 = scmp.eq.s32.totalorder %s1523_s16, 1  ;;  %p112_p3 = scmp.eq.s32.totalorder %s908_s17, 1 }
   0x9   : > { %p1532_p4 = por %p41_p1, %p40_p0  ;;  %p909_p5 = scmp.ge.s32.totalorder %s1473_s15, 1 }
   0xa   : > { %p1537_p6 = por %p112_p3, %p40_p0  ;;  %p119_p7 = scmp.lt.s32.totalorder %s1473_s15, 3 }
   0xb   : > { %s130_s22 = sshll.u32 %s1766_s1, 4  ;;  %s1475_s24 = smov [#allocation5]   ;;  %s131_s22 = int_to_ptr.hbm [resolvable:$true] %s130_s22 }
   0xc   : > { %p1545_p8 = pnand %p909_p5, %p119_p7  ;;  %s132_s25 = sshll.u32 %s1475_s24, 4  ;;  %s133_s25 = int_to_ptr.vmem [resolvable:$true] %s132_s25 }
   0xd   : > { %s1555_s26 = sadd.s32 1, %s1473_s15   ;;  %s1476_s27 = smov 64  }
   0xe   : > { %p1287_p9 = pneg %p1545_p8  ;;  %s1477_s28 = smov 4  }
   0xf   : > { %s24_s29 = ssub.s32 %s1473_s15, %s1555_s26  ;;  %s27_s30 = sadd.s32 1, %s1469_s14 }
  0x10   : > { %p1288_p10 = pnand %p1287_p9, %p41_p1  ;;  %p25_p12 = scmp.eq.s32.totalorder %s24_s29, 0 }
  0x11   : > { %p34_p13 = scmp.ne.s32.totalorder %s1469_s14, %s1465_s13  ;;  %p35_p0 = scmp.eq.s32.totalorder %s1473_s15, 0 }
  0x12   : > { %1290 = dma.hbm_to_vmem [thread:$0]  (!%p1288_p10), %s131_s22, 2048, %s133_s25, [#allocation6], %s1476_s27, %s1476_s27, %s1477_s28  }
  0x13   : > { %p1300_p3 = scmp.lt.s32.totalorder %s1473_s15, 2  ;;  %p36_p5 = por %p35_p0, %p34_p13 }
  0x14   : > { %s1565_s4 = scalar_select %p25_p12, %s1469_s14, %s27_s30  }
  0x15   : > { %p1569_p7 = por %p106_p2, %p34_p13  ;;  %s149_s6 = sand.u32 1, %s1469_s14  }
  0x16   : > { %s1118_s7 = sshll.u32 %s1473_s15, 8  ;;  %s912_s8 = sshll.u32 %s149_s6, 8 }
  0x17   : > { %s159_s11 = scalar_lea.hbm %s1765_s0, %s1118_s7  ;;  %s153_s20 = scalar_lea.vmem [#allocation2], %s912_s8 }
  0x18   : > { %s160_s17 = sshll.u32 %s159_s11, 4  ;;  %s162_s21 = sshll.u32 %s153_s20, 4  ;;  %s161_s17 = int_to_ptr.hbm [resolvable:$true] %s160_s17  ;;  %s163_s21 = int_to_ptr.vmem [resolvable:$true] %s162_s21 }
  0x19   : > { %p1580_p9 = pnand %p1300_p3, %p36_p5  ;;  %s150_s24 = scalar_lea.sflag [#allocation3], %s149_s6 }
  0x1a   : > { %s1373_s25 = sshra.s32 %s161_s17, 4  ;;  %s1380_s30 = scalar_lea.hbm %s1765_s0, 512  ;;  %s1374_s25 = int_to_ptr.hbm [resolvable:$true] %s1373_s25 }
  0x1b   : > { %s1375_s27 = scalar_lea.hbm %s1374_s25, 256  ;;  %p1377_p10 = pneg %p1580_p9 }
  0x1c   : > { %p1376_p2 = scmp.ne.s32.totalorder %s1374_s25, %s1375_s27  ;;  %p1381_p0 = scmp.lt.s32.totalorder %s1374_s25, %s1765_s0 }
  0x1d   : > { %p1382_p3 = scmp.lt.s32.totalorder %s1380_s30, %s1375_s27 }
  0x1e   : > { %p1378_p12 = pnand %p1377_p10, %p1376_p2 }
  0x1f   : > { %p1383_p5 = por %p1382_p3, %p1381_p0 }
  0x20   : > { %p1379_p13 = pneg %p1378_p12 }
  0x22   : > { %p1384_p11 = pnand %p1383_p5, %p1379_p13 }
  0x24   : > { %1387 = shalt.err (!%p1384_p11)
}
  0x25   : > { %s1478_s6 = smov 128   ;;  %s1479_s9 = smov 8  }
  0x26   : > { %1294 = dma.hbm_to_vmem [thread:$0]  (!%p1580_p9), %s161_s17, 4096, %s163_s21, %s150_s24, %s1478_s6, %s1478_s6, %s1479_s9  }
  0x27   : > { %174 = sbr.rel (%p1545_p8) target bundleno = 343 (0x157), region = 32  ;;  %s1597_s10 = sand.u32 (!%p1545_p8), 1, %s1465_s13  }
  0x28   : > { %s917_s11 = sshll.u32 (!%p1545_p8), %s1597_s10, 8  ;;  %s177_s20 = scalar_lea.sflag (!%p1545_p8), [#allocation3], %s1597_s10 }
  0x29   : > { %s1601_s25 = scalar_lea.vmem (!%p1545_p8), [#allocation2], %s917_s11 }
  0x2c   : > { %1448 = dma.done.wait (%p1532_p4), %s177_s20, 4096  }
  0x2d   : > { %1450 = vsyncadd (%p1532_p4), %s177_s20, 4294963200 }
  0x2e   : > { %1452 = dma.done.wait (%p41_p1), [#allocation6], 2048  }
  0x2f   : > { %1454 = vsyncadd (%p41_p1), [#allocation6], 4294965248  ;;  %v1158_v0 = vld [vmem:[#allocation5 + $0x38] sm:$0xff]  ;;  %v1157_v2 = vld [vmem:[#allocation5 + $0x30] sm:$0xff]  ;;  %s919_s17 = sshll.u32 %s1597_s10, 7  ;;  %s1167_s22 = sshll.u32 %s1523_s16, 7 }
  0x30   : > { %v1166_v1 = vld [vmem:[#allocation5 + $0x78] sm:$0xff]  ;;  %535 = vmatpush.bf16.msra.mxu0 %v1158_v0  ;;  %1263 = vmatpush.bf16.msra.mxu2 %v1158_v0  ;;  %v1165_v3 = vld [vmem:[#allocation5 + $0x70] sm:$0xff]  ;;  %v1156_v4 = vld [vmem:[#allocation5 + $0x28] sm:$0xff]  ;;  %s1685_s21 = scalar_lea.vmem [#allocation7], %s919_s17  ;;  %s821_s28 = scalar_lea.hbm %s1768_s3, %s1167_s22 }
  0x31   : > { %624 = vmatpush.bf16.msra.mxu1 %v1166_v1  ;;  %1271 = vmatpush.bf16.msra.mxu3 %v1166_v1  ;;  %v1164_v5 = vld [vmem:[#allocation5 + $0x68] sm:$0xff]  ;;  %v1155_v6 = vld [vmem:[#allocation5 + $0x20] sm:$0xff]  ;;  %v1154_v8 = vld [vmem:[#allocation5 + $0x18] sm:$0xff]  ;;  %s822_s29 = sshll.u32 %s1685_s21, 4  ;;  %s824_s30 = sshll.u32 %s821_s28, 4  ;;  %s823_s29 = int_to_ptr.vmem [resolvable:$true] %s822_s29  ;;  %s825_s30 = int_to_ptr.hbm [resolvable:$true] %s824_s30 }
  0x32   : > { %v1163_v7 = vld [vmem:[#allocation5 + $0x60] sm:$0xff]  ;;  %v1162_v9 = vld [vmem:[#allocation5 + $0x58] sm:$0xff]  ;;  %v1153_v10 = vld [vmem:[#allocation5 + $0x10] sm:$0xff]  ;;  %s810_s16 = scalar_lea.sflag [#allocation4], %s1597_s10  ;;  %s1417_s7 = sshra.s32 %s825_s30, 4  ;;  %s1418_s7 = int_to_ptr.hbm [resolvable:$true] %s1417_s7 }
  0x33   : > { %v1161_v11 = vld [vmem:[#allocation5 + $0x50] sm:$0xff]  ;;  %v1152_v12 = vld [vmem:[#allocation5 + $0x8] sm:$0xff]  ;;  %v1151_v14 = vld [vmem:[#allocation5] sm:$0xff]  ;;  %s1419_s8 = scalar_lea.hbm %s1418_s7, 128  ;;  %s1423_s11 = scalar_lea.hbm %s1768_s3, 256 }
  0x34   : > { %536 = vmatpush.bf16.msra.mxu0 %v1157_v2  ;;  %1264 = vmatpush.bf16.msra.mxu2 %v1157_v2  ;;  %v1160_v13 = vld [vmem:[#allocation5 + $0x48] sm:$0xff]  ;;  %v1159_v15 = vld [vmem:[#allocation5 + $0x40] sm:$0xff]  ;;  %v930_v28 = vld [vmem:[%s1601_s25 + $0x10] sm:$0xf]  ;;  %p1420_p1 = scmp.ne.s32.totalorder %s1418_s7, %s1419_s8  ;;  %p1424_p11 = scmp.lt.s32.totalorder %s1418_s7, %s1768_s3 }
  0x35   : > { %625 = vmatpush.bf16.msra.mxu1 %v1165_v3  ;;  %1272 = vmatpush.bf16.msra.mxu3 %v1165_v3  ;;  %v922_v16 = vld [vmem:[%s1601_s25] sm:$0xf]  ;;  %v1120_v17 = vld [vmem:[%s1601_s25 + $0x4] sm:$0xf0]  ;;  %v1119_v20 = vld [vmem:[%s1601_s25 + $0x4] sm:$0xf]  ;;  %p1425_p9 = scmp.lt.s32.totalorder %s1423_s11, %s1419_s8 }
  0x36   : > { %v986_v18 = vld [vmem:[%s1601_s25 + $0x80] sm:$0xf]  ;;  %v1136_v19 = vld [vmem:[%s1601_s25 + $0x84] sm:$0xf0]  ;;  %v924_v21 = vld [vmem:[%s1601_s25 + $0x8] sm:$0xf0]  ;;  %v923_v24 = vor.u32 %v1120_v17, %v922_v16  ;;  %p1421_p4 = pnand %p1420_p1, %p1569_p7 }
  0x37   : > { %v1135_v22 = vld [vmem:[%s1601_s25 + $0x84] sm:$0xf]  ;;  %v988_v23 = vld [vmem:[%s1601_s25 + $0x88] sm:$0xf0]  ;;  %v987_v25 = vor.u32 %v1136_v19, %v986_v18  ;;  %v927_v26 = vor.u32 %v1119_v20, %v924_v21  ;;  %v1122_v29 = vld [vmem:[%s1601_s25 + $0x14] sm:$0xf0]  ;;  %p1426_p2 = por %p1425_p9, %p1424_p11 }
  0x38   : > { %537 = vmatpush.bf16.msra.mxu0 %v1156_v4  ;;  %1265 = vmatpush.bf16.msra.mxu2 %v1156_v4  ;;  %v991_v27 = vor.u32 %v1135_v22, %v988_v23  ;;  %v994_v30 = vld [vmem:[%s1601_s25 + $0x90] sm:$0xf]  ;;  %v1138_v31 = vld [vmem:[%s1601_s25 + $0x94] sm:$0xf0]  ;;  %v1121_v32 = vld [vmem:[%s1601_s25 + $0x14] sm:$0xf]  ;;  %v931_v36 = vor.u32 %v1122_v29, %v930_v28  ;;  %p1422_p8 = pneg %p1421_p4 }
  0x39   : > { %626 = vmatpush.bf16.msra.mxu1 %v1164_v5  ;;  %1273 = vmatpush.bf16.msra.mxu3 %v1164_v5  ;;  %v932_v33 = vld [vmem:[%s1601_s25 + $0x18] sm:$0xf0]  ;;  %v1137_v34 = vld [vmem:[%s1601_s25 + $0x94] sm:$0xf]  ;;  %v995_v37 = vor.u32 %v1138_v31, %v994_v30  ;;  %v938_v40 = vld [vmem:[%s1601_s25 + $0x20] sm:$0xf] }
  0x3a   : > { %v996_v35 = vld [vmem:[%s1601_s25 + $0x98] sm:$0xf0]  ;;  %v935_v38 = vor.u32 %v1121_v32, %v932_v33  ;;  %v1124_v41 = vld [vmem:[%s1601_s25 + $0x24] sm:$0xf0]  ;;  %v1002_v42 = vld [vmem:[%s1601_s25 + $0xa0] sm:$0xf]  ;;  %p1427_p10 = pnand %p1426_p2, %p1422_p8 }
  0x3b   : > { %v999_v39 = vor.u32 %v1137_v34, %v996_v35  ;;  %v1140_v43 = vld [vmem:[%s1601_s25 + $0xa4] sm:$0xf0]  ;;  %v1123_v44 = vld [vmem:[%s1601_s25 + $0x24] sm:$0xf]  ;;  %v940_v45 = vld [vmem:[%s1601_s25 + $0x28] sm:$0xf0]  ;;  %v939_v48 = vor.u32 %v1124_v41, %v938_v40 }
  0x3c   : > { %538 = vmatpush.bf16.msra.mxu0 %v1155_v6  ;;  %1266 = vmatpush.bf16.msra.mxu2 %v1155_v6  ;;  %v1139_v46 = vld [vmem:[%s1601_s25 + $0xa4] sm:$0xf]  ;;  %v1004_v47 = vld [vmem:[%s1601_s25 + $0xa8] sm:$0xf0]  ;;  %v1003_v49 = vor.u32 %v1140_v43, %v1002_v42  ;;  %v943_v50 = vor.u32 %v1123_v44, %v940_v45  ;;  %v946_v52 = vld [vmem:[%s1601_s25 + $0x30] sm:$0xf] }
  0x3d   : > { %627 = vmatpush.bf16.msra.mxu1 %v1163_v7  ;;  %1274 = vmatpush.bf16.msra.mxu3 %v1163_v7  ;;  %v1007_v51 = vor.u32 %v1139_v46, %v1004_v47  ;;  %v1126_v53 = vld [vmem:[%s1601_s25 + $0x34] sm:$0xf0]  ;;  %v1010_v54 = vld [vmem:[%s1601_s25 + $0xb0] sm:$0xf]  ;;  %v1125_v56 = vld [vmem:[%s1601_s25 + $0x34] sm:$0xf] }
  0x3e   : > { %v1142_v55 = vld [vmem:[%s1601_s25 + $0xb4] sm:$0xf0]  ;;  %v948_v57 = vld [vmem:[%s1601_s25 + $0x38] sm:$0xf0]  ;;  %v1141_v58 = vld [vmem:[%s1601_s25 + $0xb4] sm:$0xf]  ;;  %v947_v60 = vor.u32 %v1126_v53, %v946_v52 }
  0x3f   : > { %v1012_v59 = vld [vmem:[%s1601_s25 + $0xb8] sm:$0xf0]  ;;  %v1011_v61 = vor.u32 %v1142_v55, %v1010_v54  ;;  %v951_v62 = vor.u32 %v1125_v56, %v948_v57  ;;  %v954_v0 = vld [vmem:[%s1601_s25 + $0x40] sm:$0xf]  ;;  %v1128_v1 = vld [vmem:[%s1601_s25 + $0x44] sm:$0xf0] }
  0x40   : > { %539 = vmatpush.bf16.msra.mxu0 %v1154_v8  ;;  %1267 = vmatpush.bf16.msra.mxu2 %v1154_v8  ;;  %v1015_v63 = vor.u32 %v1141_v58, %v1012_v59  ;;  %v1018_v2 = vld [vmem:[%s1601_s25 + $0xc0] sm:$0xf]  ;;  %v1144_v3 = vld [vmem:[%s1601_s25 + $0xc4] sm:$0xf0]  ;;  %v1127_v4 = vld [vmem:[%s1601_s25 + $0x44] sm:$0xf]  ;;  %v955_v8 = vor.u32 %v1128_v1, %v954_v0 }
  0x41   : > { %628 = vmatpush.bf16.msra.mxu1 %v1162_v9  ;;  %1275 = vmatpush.bf16.msra.mxu3 %v1162_v9  ;;  %v956_v5 = vld [vmem:[%s1601_s25 + $0x48] sm:$0xf0]  ;;  %v1143_v6 = vld [vmem:[%s1601_s25 + $0xc4] sm:$0xf]  ;;  %v1019_v9 = vor.u32 %v1144_v3, %v1018_v2  ;;  %v1129_v16 = vld [vmem:[%s1601_s25 + $0x54] sm:$0xf] }
  0x42   : > { %v1020_v7 = vld [vmem:[%s1601_s25 + $0xc8] sm:$0xf0]  ;;  %v964_v17 = vld [vmem:[%s1601_s25 + $0x58] sm:$0xf0]  ;;  %v1145_v18 = vld [vmem:[%s1601_s25 + $0xd4] sm:$0xf] }
  0x43   : > { %v1028_v19 = vld [vmem:[%s1601_s25 + $0xd8] sm:$0xf0]  ;;  %v967_v22 = vor.u32 %v1129_v16, %v964_v17  ;;  %v1131_v28 = vld [vmem:[%s1601_s25 + $0x64] sm:$0xf]  ;;  %v972_v29 = vld [vmem:[%s1601_s25 + $0x68] sm:$0xf0] }
  0x44   : > { %540 = vmatpush.bf16.msra.mxu0 %v1153_v10  ;;  %1268 = vmatpush.bf16.msra.mxu2 %v1153_v10  ;;  %v959_v10 = vor.u32 %v1127_v4, %v956_v5  ;;  %v1031_v23 = vor.u32 %v1145_v18, %v1028_v19  ;;  %v1147_v30 = vld [vmem:[%s1601_s25 + $0xe4] sm:$0xf]  ;;  %v1036_v31 = vld [vmem:[%s1601_s25 + $0xe8] sm:$0xf0]  ;;  %v975_v34 = vor.u32 %v1131_v28, %v972_v29  ;;  %v1133_v40 = vld [vmem:[%s1601_s25 + $0x74] sm:$0xf] }
  0x45   : > { %629 = vmatpush.bf16.msra.mxu1 %v1161_v11  ;;  %1276 = vmatpush.bf16.msra.mxu3 %v1161_v11  ;;  %v1023_v11 = vor.u32 %v1143_v6, %v1020_v7  ;;  %v1039_v35 = vor.u32 %v1147_v30, %v1036_v31  ;;  %v980_v41 = vld [vmem:[%s1601_s25 + $0x78] sm:$0xf0]  ;;  %v1149_v42 = vld [vmem:[%s1601_s25 + $0xf4] sm:$0xf] }
  0x46   : > { %v1044_v43 = vld [vmem:[%s1601_s25 + $0xf8] sm:$0xf0]  ;;  %v983_v46 = vor.u32 %v1133_v40, %v980_v41 }
  0x47   : > { %v1047_v47 = vor.u32 %v1149_v42, %v1044_v43 }
  0x48   : > { %541 = vmatpush.bf16.msra.mxu0 %v1152_v12  ;;  %1269 = vmatpush.bf16.msra.mxu2 %v1152_v12  ;;  %v962_v12 = vld [vmem:[%s1601_s25 + $0x50] sm:$0xf] }
  0x49   : > { %630 = vmatpush.bf16.msra.mxu1 %v1160_v13  ;;  %1277 = vmatpush.bf16.msra.mxu3 %v1160_v13  ;;  %v1130_v13 = vld [vmem:[%s1601_s25 + $0x54] sm:$0xf0] }
  0x4a   : > { %v963_v20 = vor.u32 %v1130_v13, %v962_v12 }
  0x4c   : > { %542 = vmatpush.bf16.msra.mxu0 %v1151_v14  ;;  %1270 = vmatpush.bf16.msra.mxu2 %v1151_v14  ;;  %v1026_v14 = vld [vmem:[%s1601_s25 + $0xd0] sm:$0xf] }
  0x4d   : > { %631 = vmatpush.bf16.msra.mxu1 %v1159_v15  ;;  %1278 = vmatpush.bf16.msra.mxu3 %v1159_v15  ;;  %v1146_v15 = vld [vmem:[%s1601_s25 + $0xd4] sm:$0xf0] }
  0x4e   : > { %v1027_v21 = vor.u32 %v1146_v15, %v1026_v14 }
  0x4f   : > { %543 = vmatmul.bf16.vlgmr.msra.gmra.mxu0 %v923_v24  ;;  %583 = vmatmul.bf16.vlgmr.msra.gmra.mxu2 %v987_v25  ;;  %v970_v24 = vld [vmem:[%s1601_s25 + $0x60] sm:$0xf]  ;;  %v1132_v25 = vld [vmem:[%s1601_s25 + $0x64] sm:$0xf0] }
  0x50   : > { %632 = vmatmul.bf16.vlgmr.msra.gmra.mxu1 %v927_v26  ;;  %672 = vmatmul.bf16.vlgmr.msra.gmra.mxu3 %v991_v27  ;;  %v1034_v26 = vld [vmem:[%s1601_s25 + $0xe0] sm:$0xf]  ;;  %v1148_v27 = vld [vmem:[%s1601_s25 + $0xe4] sm:$0xf0]  ;;  %v971_v32 = vor.u32 %v1132_v25, %v970_v24 }
  0x51   : > { %v1035_v33 = vor.u32 %v1148_v27, %v1034_v26 }
  0x5f   : > { %548 = vmatmul.bf16.gmra.mxu0 %v931_v36  ;;  %588 = vmatmul.bf16.gmra.mxu2 %v995_v37  ;;  %v978_v36 = vld [vmem:[%s1601_s25 + $0x70] sm:$0xf]  ;;  %v1134_v37 = vld [vmem:[%s1601_s25 + $0x74] sm:$0xf0] }
  0x60   : > { %637 = vmatmul.bf16.gmra.mxu1 %v935_v38  ;;  %677 = vmatmul.bf16.gmra.mxu3 %v999_v39  ;;  %v1042_v38 = vld [vmem:[%s1601_s25 + $0xf0] sm:$0xf]  ;;  %v1150_v39 = vld [vmem:[%s1601_s25 + $0xf4] sm:$0xf0]  ;;  %v979_v44 = vor.u32 %v1134_v37, %v978_v36 }
  0x61   : > { %v1043_v45 = vor.u32 %v1150_v39, %v1042_v38 }
  0x6f   : > { %553 = vmatmul.bf16.gmra.mxu0 %v939_v48  ;;  %593 = vmatmul.bf16.gmra.mxu2 %v1003_v49  ;;  %v1678_v49 = vld [vmem:[%s1767_s2] ss:$0 sm:$0xff] }
  0x70   : > { %642 = vmatmul.bf16.gmra.mxu1 %v943_v50  ;;  %682 = vmatmul.bf16.gmra.mxu3 %v1007_v51 }
  0x7f   : > { %558 = vmatmul.bf16.gmra.mxu0 %v947_v60  ;;  %598 = vmatmul.bf16.gmra.mxu2 %v1011_v61 }
  0x80   : > { %647 = vmatmul.bf16.gmra.mxu1 %v951_v62  ;;  %687 = vmatmul.bf16.gmra.mxu3 %v1015_v63 }
  0x8f   : > { %563 = vmatmul.bf16.gmra.mxu0 %v955_v8  ;;  %603 = vmatmul.bf16.gmra.mxu2 %v1019_v9 }
  0x90   : > { %652 = vmatmul.bf16.gmra.mxu1 %v959_v10  ;;  %692 = vmatmul.bf16.gmra.mxu3 %v1023_v11 }
  0x9f   : > { %568 = vmatmul.bf16.gmra.mxu0 %v963_v20  ;;  %608 = vmatmul.bf16.gmra.mxu2 %v1027_v21 }
  0xa0   : > { %657 = vmatmul.bf16.gmra.mxu1 %v967_v22  ;;  %697 = vmatmul.bf16.gmra.mxu3 %v1031_v23 }
  0xaf   : > { %573 = vmatmul.bf16.gmra.mxu0 %v971_v32  ;;  %613 = vmatmul.bf16.gmra.mxu2 %v1035_v33 }
  0xb0   : > { %662 = vmatmul.bf16.gmra.mxu1 %v975_v34  ;;  %702 = vmatmul.bf16.gmra.mxu3 %v1039_v35 }
  0xbf   : > { %578 = vmatmul.bf16.gmra.mxu0 %v979_v44  ;;  %618 = vmatmul.bf16.gmra.mxu2 %v1043_v45 }
  0xc0   : > { %667 = vmatmul.bf16.gmra.mxu1 %v983_v46  ;;  %707 = vmatmul.bf16.gmra.mxu3 %v1047_v47 }
  0xcc   : > { %v544_v48 = vpop.f32.mrf.mxu0 }
  0xcd   : > { %v633_v50 = vpop.f32.mrf.mxu1  ;;  %v545_v51 = vadd.f32 %v1678_v49, %v544_v48 }
  0xcf   : > { %v634_v55 = vadd.f32 %v633_v50, %v545_v51 }
  0xd1   : > { %v713_v60 = vmax.f32 %v634_v55, 0.0 }
  0xd2   : > { %v584_v52 = vpop.f32.mrf.mxu2 }
  0xd3   : > { %v673_v53 = vpop.f32.mrf.mxu3  ;;  %v585_v58 = vadd.f32 %v1678_v49, %v584_v52 }
  0xd4   : > { %v546_v54 = vpop.f32.mrf.mxu0 }
  0xd5   : > { %v547_v56 = vadd.f32 %v1678_v49, %v546_v54  ;;  %v635_v57 = vpop.f32.mrf.mxu1  ;;  %v674_v63 = vadd.f32 %v673_v53, %v585_v58 }
  0xd7   : > { %v636_v59 = vadd.f32 %v635_v57, %v547_v56  ;;  %v729_v6 = vmax.f32 %v674_v63, 0.0 }
  0xd9   : > { %v714_v61 = vmax.f32 %v636_v59, 0.0 }
  0xda   : > { %v586_v62 = vpop.f32.mrf.mxu2 }
  0xdb   : > { %v1171_v0 = vpack.c.bf16 %v714_v61, %v713_v60  ;;  %v587_v1 = vadd.f32 %v1678_v49, %v586_v62  ;;  %v675_v2 = vpop.f32.mrf.mxu3 }
  0xdc   : > { %v549_v3 = vpop.f32.mrf.mxu0 }
  0xdd   : > { %1172 = vst [vmem:[%s1685_s21] sm:$0xff] %v1171_v0   ;;  %v676_v4 = vadd.f32 %v675_v2, %v587_v1  ;;  %v638_v5 = vpop.f32.mrf.mxu1  ;;  %v550_v9 = vadd.f32 %v1678_v49, %v549_v3 }
  0xdf   : > { %v730_v7 = vmax.f32 %v676_v4, 0.0  ;;  %v639_v13 = vadd.f32 %v638_v5, %v550_v9 }
  0xe1   : > { %v1211_v8 = vpack.c.bf16 %v730_v7, %v729_v6  ;;  %v715_v18 = vmax.f32 %v639_v13, 0.0 }
  0xe2   : > { %v589_v10 = vpop.f32.mrf.mxu2 }
  0xe3   : > { %1255 = vst [vmem:[%s1685_s21 + $0x40] sm:$0xff] %v1211_v8   ;;  %v678_v11 = vpop.f32.mrf.mxu3  ;;  %v590_v16 = vadd.f32 %v1678_v49, %v589_v10 }
  0xe4   : > { %v551_v12 = vpop.f32.mrf.mxu0 }
  0xe5   : > { %v552_v14 = vadd.f32 %v1678_v49, %v551_v12  ;;  %v640_v15 = vpop.f32.mrf.mxu1  ;;  %v679_v21 = vadd.f32 %v678_v11, %v590_v16 }
  0xe7   : > { %v641_v17 = vadd.f32 %v640_v15, %v552_v14  ;;  %v731_v28 = vmax.f32 %v679_v21, 0.0 }
  0xe9   : > { %v716_v19 = vmax.f32 %v641_v17, 0.0 }
  0xea   : > { %v591_v20 = vpop.f32.mrf.mxu2 }
  0xeb   : > { %v1176_v22 = vpack.c.bf16 %v716_v19, %v715_v18  ;;  %v592_v23 = vadd.f32 %v1678_v49, %v591_v20  ;;  %v680_v24 = vpop.f32.mrf.mxu3 }
  0xec   : > { %v554_v25 = vpop.f32.mrf.mxu0 }
  0xed   : > { %1248 = vst [vmem:[%s1685_s21 + $0x8] sm:$0xff] %v1176_v22   ;;  %v681_v26 = vadd.f32 %v680_v24, %v592_v23  ;;  %v643_v27 = vpop.f32.mrf.mxu1  ;;  %v555_v31 = vadd.f32 %v1678_v49, %v554_v25 }
  0xef   : > { %v732_v29 = vmax.f32 %v681_v26, 0.0  ;;  %v644_v35 = vadd.f32 %v643_v27, %v555_v31 }
  0xf1   : > { %v1216_v30 = vpack.c.bf16 %v732_v29, %v731_v28  ;;  %v717_v40 = vmax.f32 %v644_v35, 0.0 }
  0xf2   : > { %v594_v32 = vpop.f32.mrf.mxu2 }
  0xf3   : > { %1256 = vst [vmem:[%s1685_s21 + $0x48] sm:$0xff] %v1216_v30   ;;  %v683_v33 = vpop.f32.mrf.mxu3  ;;  %v595_v38 = vadd.f32 %v1678_v49, %v594_v32 }
  0xf4   : > { %v556_v34 = vpop.f32.mrf.mxu0 }
  0xf5   : > { %v557_v36 = vadd.f32 %v1678_v49, %v556_v34  ;;  %v645_v37 = vpop.f32.mrf.mxu1  ;;  %v684_v43 = vadd.f32 %v683_v33, %v595_v38 }
  0xf7   : > { %v646_v39 = vadd.f32 %v645_v37, %v557_v36  ;;  %v733_v51 = vmax.f32 %v684_v43, 0.0 }
  0xf9   : > { %v718_v41 = vmax.f32 %v646_v39, 0.0 }
  0xfa   : > { %v596_v42 = vpop.f32.mrf.mxu2 }
  0xfb   : > { %v1181_v44 = vpack.c.bf16 %v718_v41, %v717_v40  ;;  %v597_v45 = vadd.f32 %v1678_v49, %v596_v42  ;;  %v685_v46 = vpop.f32.mrf.mxu3 }
  0xfc   : > { %v559_v47 = vpop.f32.mrf.mxu0 }
  0xfd   : > { %1249 = vst [vmem:[%s1685_s21 + $0x10] sm:$0xff] %v1181_v44   ;;  %v686_v48 = vadd.f32 %v685_v46, %v597_v45  ;;  %v648_v50 = vpop.f32.mrf.mxu1  ;;  %v560_v54 = vadd.f32 %v1678_v49, %v559_v47 }
  0xff   : > { %v734_v52 = vmax.f32 %v686_v48, 0.0  ;;  %v649_v58 = vadd.f32 %v648_v50, %v560_v54 }
 0x101   : > { %v1221_v53 = vpack.c.bf16 %v734_v52, %v733_v51  ;;  %v719_v63 = vmax.f32 %v649_v58, 0.0 }
 0x102   : > { %v599_v55 = vpop.f32.mrf.mxu2 }
 0x103   : > { %1257 = vst [vmem:[%s1685_s21 + $0x50] sm:$0xff] %v1221_v53   ;;  %v688_v56 = vpop.f32.mrf.mxu3  ;;  %v600_v61 = vadd.f32 %v1678_v49, %v599_v55 }
 0x104   : > { %v561_v57 = vpop.f32.mrf.mxu0 }
 0x105   : > { %v562_v59 = vadd.f32 %v1678_v49, %v561_v57  ;;  %v650_v60 = vpop.f32.mrf.mxu1  ;;  %v689_v2 = vadd.f32 %v688_v56, %v600_v61 }
 0x107   : > { %v651_v62 = vadd.f32 %v650_v60, %v562_v59  ;;  %v735_v9 = vmax.f32 %v689_v2, 0.0 }
 0x109   : > { %v720_v0 = vmax.f32 %v651_v62, 0.0 }
 0x10a   : > { %v601_v1 = vpop.f32.mrf.mxu2 }
 0x10b   : > { %v1186_v3 = vpack.c.bf16 %v720_v0, %v719_v63  ;;  %v602_v4 = vadd.f32 %v1678_v49, %v601_v1  ;;  %v690_v5 = vpop.f32.mrf.mxu3 }
 0x10c   : > { %v564_v6 = vpop.f32.mrf.mxu0 }
 0x10d   : > { %1250 = vst [vmem:[%s1685_s21 + $0x18] sm:$0xff] %v1186_v3   ;;  %v691_v7 = vadd.f32 %v690_v5, %v602_v4  ;;  %v653_v8 = vpop.f32.mrf.mxu1  ;;  %v565_v12 = vadd.f32 %v1678_v49, %v564_v6 }
 0x10f   : > { %v736_v10 = vmax.f32 %v691_v7, 0.0  ;;  %v654_v16 = vadd.f32 %v653_v8, %v565_v12 }
 0x111   : > { %v1226_v11 = vpack.c.bf16 %v736_v10, %v735_v9  ;;  %v721_v21 = vmax.f32 %v654_v16, 0.0 }
 0x112   : > { %v604_v13 = vpop.f32.mrf.mxu2 }
 0x113   : > { %1258 = vst [vmem:[%s1685_s21 + $0x58] sm:$0xff] %v1226_v11   ;;  %v693_v14 = vpop.f32.mrf.mxu3  ;;  %v605_v19 = vadd.f32 %v1678_v49, %v604_v13 }
 0x114   : > { %v566_v15 = vpop.f32.mrf.mxu0 }
 0x115   : > { %v567_v17 = vadd.f32 %v1678_v49, %v566_v15  ;;  %v655_v18 = vpop.f32.mrf.mxu1  ;;  %v694_v24 = vadd.f32 %v693_v14, %v605_v19 }
 0x117   : > { %v656_v20 = vadd.f32 %v655_v18, %v567_v17  ;;  %v737_v31 = vmax.f32 %v694_v24, 0.0 }
 0x119   : > { %v722_v22 = vmax.f32 %v656_v20, 0.0 }
 0x11a   : > { %v606_v23 = vpop.f32.mrf.mxu2 }
 0x11b   : > { %v1191_v25 = vpack.c.bf16 %v722_v22, %v721_v21  ;;  %v607_v26 = vadd.f32 %v1678_v49, %v606_v23  ;;  %v695_v27 = vpop.f32.mrf.mxu3 }
 0x11c   : > { %v569_v28 = vpop.f32.mrf.mxu0 }
 0x11d   : > { %1251 = vst [vmem:[%s1685_s21 + $0x20] sm:$0xff] %v1191_v25   ;;  %v696_v29 = vadd.f32 %v695_v27, %v607_v26  ;;  %v658_v30 = vpop.f32.mrf.mxu1  ;;  %v570_v34 = vadd.f32 %v1678_v49, %v569_v28 }
 0x11f   : > { %v738_v32 = vmax.f32 %v696_v29, 0.0  ;;  %v659_v38 = vadd.f32 %v658_v30, %v570_v34 }
 0x121   : > { %v1231_v33 = vpack.c.bf16 %v738_v32, %v737_v31  ;;  %v723_v43 = vmax.f32 %v659_v38, 0.0 }
 0x122   : > { %v609_v35 = vpop.f32.mrf.mxu2 }
 0x123   : > { %1259 = vst [vmem:[%s1685_s21 + $0x60] sm:$0xff] %v1231_v33   ;;  %v698_v36 = vpop.f32.mrf.mxu3  ;;  %v610_v41 = vadd.f32 %v1678_v49, %v609_v35 }
 0x124   : > { %v571_v37 = vpop.f32.mrf.mxu0 }
 0x125   : > { %v572_v39 = vadd.f32 %v1678_v49, %v571_v37  ;;  %v660_v40 = vpop.f32.mrf.mxu1  ;;  %v699_v46 = vadd.f32 %v698_v36, %v610_v41 }
 0x127   : > { %v661_v42 = vadd.f32 %v660_v40, %v572_v39  ;;  %v739_v54 = vmax.f32 %v699_v46, 0.0 }
 0x129   : > { %v724_v44 = vmax.f32 %v661_v42, 0.0 }
 0x12a   : > { %v611_v45 = vpop.f32.mrf.mxu2 }
 0x12b   : > { %v1196_v47 = vpack.c.bf16 %v724_v44, %v723_v43  ;;  %v612_v48 = vadd.f32 %v1678_v49, %v611_v45  ;;  %v700_v50 = vpop.f32.mrf.mxu3 }
 0x12c   : > { %v574_v51 = vpop.f32.mrf.mxu0 }
 0x12d   : > { %1252 = vst [vmem:[%s1685_s21 + $0x28] sm:$0xff] %v1196_v47   ;;  %v701_v52 = vadd.f32 %v700_v50, %v612_v48  ;;  %v663_v53 = vpop.f32.mrf.mxu1  ;;  %v575_v57 = vadd.f32 %v1678_v49, %v574_v51 }
 0x12f   : > { %v740_v55 = vmax.f32 %v701_v52, 0.0  ;;  %v664_v61 = vadd.f32 %v663_v53, %v575_v57 }
 0x131   : > { %v1236_v56 = vpack.c.bf16 %v740_v55, %v739_v54  ;;  %v725_v2 = vmax.f32 %v664_v61, 0.0 }
 0x132   : > { %v614_v58 = vpop.f32.mrf.mxu2 }
 0x133   : > { %1260 = vst [vmem:[%s1685_s21 + $0x68] sm:$0xff] %v1236_v56   ;;  %v703_v59 = vpop.f32.mrf.mxu3  ;;  %v615_v0 = vadd.f32 %v1678_v49, %v614_v58 }
 0x134   : > { %v576_v60 = vpop.f32.mrf.mxu0 }
 0x135   : > { %v577_v62 = vadd.f32 %v1678_v49, %v576_v60  ;;  %v665_v63 = vpop.f32.mrf.mxu1  ;;  %v704_v5 = vadd.f32 %v703_v59, %v615_v0 }
 0x137   : > { %v666_v1 = vadd.f32 %v665_v63, %v577_v62  ;;  %v741_v12 = vmax.f32 %v704_v5, 0.0 }
 0x139   : > { %v726_v3 = vmax.f32 %v666_v1, 0.0 }
 0x13a   : > { %v616_v4 = vpop.f32.mrf.mxu2 }
 0x13b   : > { %v1201_v6 = vpack.c.bf16 %v726_v3, %v725_v2  ;;  %v617_v7 = vadd.f32 %v1678_v49, %v616_v4  ;;  %v705_v8 = vpop.f32.mrf.mxu3 }
 0x13c   : > { %v579_v9 = vpop.f32.mrf.mxu0 }
 0x13d   : > { %1253 = vst [vmem:[%s1685_s21 + $0x30] sm:$0xff] %v1201_v6   ;;  %v706_v10 = vadd.f32 %v705_v8, %v617_v7  ;;  %v668_v11 = vpop.f32.mrf.mxu1  ;;  %v580_v15 = vadd.f32 %v1678_v49, %v579_v9 }
 0x13f   : > { %v742_v13 = vmax.f32 %v706_v10, 0.0  ;;  %v669_v19 = vadd.f32 %v668_v11, %v580_v15 }
 0x141   : > { %v1241_v14 = vpack.c.bf16 %v742_v13, %v741_v12  ;;  %v727_v24 = vmax.f32 %v669_v19, 0.0 }
 0x142   : > { %v619_v16 = vpop.f32.mrf.mxu2 }
 0x143   : > { %1261 = vst [vmem:[%s1685_s21 + $0x70] sm:$0xff] %v1241_v14   ;;  %v708_v17 = vpop.f32.mrf.mxu3  ;;  %v620_v22 = vadd.f32 %v1678_v49, %v619_v16 }
 0x144   : > { %v581_v18 = vpop.f32.mrf.mxu0 }
 0x145   : > { %v582_v20 = vadd.f32 %v1678_v49, %v581_v18  ;;  %v670_v21 = vpop.f32.mrf.mxu1  ;;  %v709_v27 = vadd.f32 %v708_v17, %v620_v22 }
 0x147   : > { %v671_v23 = vadd.f32 %v670_v21, %v582_v20  ;;  %v743_v32 = vmax.f32 %v709_v27, 0.0 }
 0x149   : > { %v728_v25 = vmax.f32 %v671_v23, 0.0 }
 0x14a   : > { %v621_v26 = vpop.f32.mrf.mxu2 }
 0x14b   : > { %v1206_v28 = vpack.c.bf16 %v728_v25, %v727_v24  ;;  %v622_v29 = vadd.f32 %v1678_v49, %v621_v26  ;;  %v710_v30 = vpop.f32.mrf.mxu3 }
 0x14d   : > { %1254 = vst [vmem:[%s1685_s21 + $0x38] sm:$0xff] %v1206_v28   ;;  %v711_v31 = vadd.f32 %v710_v30, %v622_v29 }
 0x14f   : > { %v744_v33 = vmax.f32 %v711_v31, 0.0 }
 0x151   : > { %v1246_v34 = vpack.c.bf16 %v744_v33, %v743_v32 }
 0x153   : > { %1262 = vst [vmem:[%s1685_s21 + $0x78] sm:$0xff] %v1246_v34  }
 0x154   : > { %1430 = shalt.err (!%p1427_p10)
}
 0x155   : > { %s1480_s10 = smov 64   ;;  %s1481_s18 = smov 4  }
 0x156   : > { %1285 = dma.vmem_to_hbm [thread:$0]  (%p1569_p7), %s823_s29, 2048, %s825_s30, %s810_s16, %s1480_s10, %s1480_s10, %s1481_s18  }
 0x157 PF: > { %s839_s23 = sand.u32 1, %s1461_s12   ;;  %p1774_p12 = scmp.ge.s32.totalorder %s1473_s15, 2 }
 0x158   : > { %s840_s17 = scalar_lea.sflag [#allocation4], %s839_s23 }
 0x159   : > { %p1296_p13 = pnand %p1774_p12, %p1537_p6 }
 0x15b   : > { %p1297_p0 = pneg %p1296_p13 }
 0x15d   : > { %1456 = dma.done.wait (%p1297_p0), %s840_s17, 2048  }
 0x15e   : > { %1458 = vsyncadd (%p1297_p0), %s840_s17, 4294965248  ;;  %p17_p3 = scmp.ge.s32.totalorder %s1555_s26, 4   ;;  %s1775_s12 = smov %s1465_s13 }
 0x15f   : > { %s1776_s13 = smov %s1469_s14  ;;  %s1777_s14 = smov %s1565_s4 }
 0x160   : > { %s1778_s15 = smov %s1555_s26  ;;  %19 = sbr.rel (!%p17_p3) target bundleno = 6 (0x6), region = 81 }
 0x165   :  { %846 = vsyncpa [#allocation3], 1 }
 0x166   :  { %848 = vsyncpa [#allocation3 + $0x1], 1 }
 0x167   :  { %849 = vsyncpa [#allocation6], 1 }
 0x168   :  { %850 = vsyncpa [#allocation4], 1 }
 0x169   :  { %852 = vsyncpa [#allocation4 + $0x1], 1 }

</bundles_post_ra>
